<compile_context>
chip_gen: v6e
topology: v6e:2x2x1
jax: 0.10.0
libtpu: 0.0.40
codegen_flags: <defaults>
</compile_context>

<pallas_src>
import math

import jax
import jax.numpy as jnp
from jax.experimental import pallas as pl
from jax.experimental.pallas import tpu as pltpu


# ----------------------------------------------------------------------------
# small helpers
# ----------------------------------------------------------------------------
_SQRT_2_OVER_PI = math.sqrt(2.0 / math.pi)
_LN_EPS = 1e-12


def _gelu_tanh(x):
    # tanh-approx GELU; identical math in-kernel and in the pure-JAX reference.
    return 0.5 * x * (1.0 + jnp.tanh(_SQRT_2_OVER_PI * (x + 0.044715 * x * x * x)))


def _round_up(n, m):
    return ((n + m - 1) // m) * m


def _row_tiling(M):
    # Weights are VMEM-resident (constant index_map), so only x / output tiles
    # scale with tm -> use large row tiles and align to 128 when possible.
    if M >= 128:
        tm = min(512, _round_up(M, 128))
    else:
        tm = _round_up(M, 8)
    m_pad = _round_up(M, tm)
    return tm, m_pad


def _pad_rows(x2d, m_pad):
    M = x2d.shape[0]
    if m_pad == M:
        return x2d
    return jnp.pad(x2d, ((0, m_pad - M), (0, 0)))


def _compiler_params():
    return pltpu.CompilerParams(
        dimension_semantics=("parallel",),
        vmem_limit_bytes=64 * 1024 * 1024,
    )


def _layernorm_f32(y, gamma, beta):
    mu = jnp.mean(y, axis=-1, keepdims=True)
    var = jnp.mean(jnp.square(y - mu), axis=-1, keepdims=True)
    return (y - mu) * jax.lax.rsqrt(var + _LN_EPS) * gamma + beta


# ----------------------------------------------------------------------------
# Pallas kernels
# ----------------------------------------------------------------------------
def _lora_linear_kernel(x_ref, wcat_ref, bmat_ref, bias_ref, o_ref):
    """Exact _LoRALayer_multimodal hot path: y = x@[W^T|A^T] -> base + z_l@B^T + b."""
    dout = o_ref.shape[-1]
    z = jnp.dot(x_ref[...], wcat_ref[...], preferred_element_type=jnp.float32)
    lora = jnp.dot(z[:, dout:], bmat_ref[...], preferred_element_type=jnp.float32)
    o_ref[...] = (z[:, :dout] + lora + bias_ref[...]).astype(o_ref.dtype)


def _qkv_lora_kernel(x_ref, wcat_ref, bq_ref, bv_ref, bias_ref,
                     q_ref, k_ref, v_ref):
    """Fused QKV + LoRA(q, v): one MXU pass over [Wq^T|Wk^T|Wv^T|Aq^T|Av^T],
    three separate lane-dense outputs (no XLA re-slicing)."""
    D = q_ref.shape[-1]
    r = bq_ref.shape[0]
    z = jnp.dot(x_ref[...], wcat_ref[...], preferred_element_type=jnp.float32)
    bias = bias_ref[...]                       # f32 (1, 3D)
    zq_l = z[:, 3 * D: 3 * D + r]              # stays f32 (no double rounding)
    zv_l = z[:, 3 * D + r: 3 * D + 2 * r]
    q = z[:, :D] + bias[:, :D] + jnp.dot(
        zq_l, bq_ref[...], preferred_element_type=jnp.float32)
    k = z[:, D:2 * D] + bias[:, D:2 * D]
    v = z[:, 2 * D:3 * D] + bias[:, 2 * D:3 * D] + jnp.dot(
        zv_l, bv_ref[...], preferred_element_type=jnp.float32)
    q_ref[...] = q.astype(q_ref.dtype)
    k_ref[...] = k.astype(k_ref.dtype)
    v_ref[...] = v.astype(v_ref.dtype)


def _linear_res_ln_kernel(x_ref, wt_ref, bias_ref, res_ref, g_ref, b_ref, o_ref):
    """y = LayerNorm(x @ W^T + bias + residual)  (attn-output projection)."""
    y = jnp.dot(x_ref[...], wt_ref[...], preferred_element_type=jnp.float32)
    y = y + bias_ref[...] + res_ref[...].astype(jnp.float32)
    o_ref[...] = _layernorm_f32(y, g_ref[...], b_ref[...]).astype(o_ref.dtype)


def _ffn_res_ln_kernel(x_ref, wi_ref, bi_ref, wo2_ref, bo2_ref,
                       g_ref, b_ref, o_ref):
    """Whole FFN block: LN(gelu(x@Wi^T + bi)@Wo2^T + bo2 + x); the (tm, inter)
    intermediate never leaves VMEM."""
    x = x_ref[...]
    h = jnp.dot(x, wi_ref[...], preferred_element_type=jnp.float32) + bi_ref[...]
    h = _gelu_tanh(h).astype(wo2_ref.dtype)
    y = jnp.dot(h, wo2_ref[...], preferred_element_type=jnp.float32) + bo2_ref[...]
    y = y + x.astype(jnp.float32)
    o_ref[...] = _layernorm_f32(y, g_ref[...], b_ref[...]).astype(o_ref.dtype)


# ----------------------------------------------------------------------------
# wrappers
# ----------------------------------------------------------------------------
def lora_linear_pallas(x2d, wcat, bmat, bias2d):
    """LoRA-augmented linear (the literal _LoRALayer_multimodal op).

    x2d   : (M, Din); wcat: (Din, Dout + r) pre-packed [W^T | A^T]
    bmat  : (r, Dout) = B^T (f32); bias2d: (1, Dout) (f32)
    """
    M, Din = x2d.shape
    Dout = bias2d.shape[1]
    r = wcat.shape[1] - Dout
    assert bmat.shape == (r, Dout)
    tm, m_pad = _row_tiling(M)
    xp = _pad_rows(x2d, m_pad)
    isz = jnp.dtype(x2d.dtype).itemsize
    flops = 2 * m_pad * Din * (Dout + r) + 2 * m_pad * r * Dout
    bytes_accessed = isz * (m_pad * Din + Din * (Dout + r) + m_pad * Dout) \
        + 4 * (r * Dout + Dout)
    out = pl.pallas_call(
        _lora_linear_kernel,
        out_shape=jax.ShapeDtypeStruct((m_pad, Dout), x2d.dtype),
        grid_spec=pltpu.PrefetchScalarGridSpec(
            num_scalar_prefetch=0,
            grid=(m_pad // tm,),
            in_specs=[
                pl.BlockSpec((tm, Din), lambda i: (i, 0)),
                pl.BlockSpec((Din, Dout + r), lambda i: (0, 0)),
                pl.BlockSpec((r, Dout), lambda i: (0, 0)),
                pl.BlockSpec((1, Dout), lambda i: (0, 0)),
            ],
            out_specs=pl.BlockSpec((tm, Dout), lambda i: (i, 0)),
        ),
        compiler_params=_compiler_params(),
        cost_estimate=pl.CostEstimate(
            flops=flops, transcendentals=0, bytes_accessed=bytes_accessed),
    )(xp, wcat, bmat, bias2d)
    return out if m_pad == M else out[:M]


def qkv_lora_pallas(x2d, wcat, bq_lora, bv_lora, bias):
    """Fused QKV + LoRA(q, v); returns (q, k, v), each (M, D)."""
    M, Din = x2d.shape
    r, D = bq_lora.shape
    assert wcat.shape == (Din, 3 * D + 2 * r)
    tm, m_pad = _row_tiling(M)
    xp = _pad_rows(x2d, m_pad)
    isz = jnp.dtype(x2d.dtype).itemsize
    flops = 2 * m_pad * Din * (3 * D + 2 * r) + 2 * 2 * m_pad * r * D
    bytes_accessed = isz * (m_pad * Din + Din * (3 * D + 2 * r) + 3 * m_pad * D) \
        + 4 * (2 * r * D + 3 * D)
    q, k, v = pl.pallas_call(
        _qkv_lora_kernel,
        out_shape=tuple(jax.ShapeDtypeStruct((m_pad, D), x2d.dtype)
                        for _ in range(3)),
        grid_spec=pltpu.PrefetchScalarGridSpec(
            num_scalar_prefetch=0,
            grid=(m_pad // tm,),
            in_specs=[
                pl.BlockSpec((tm, Din), lambda i: (i, 0)),
                pl.BlockSpec((Din, 3 * D + 2 * r), lambda i: (0, 0)),
                pl.BlockSpec((r, D), lambda i: (0, 0)),
                pl.BlockSpec((r, D), lambda i: (0, 0)),
                pl.BlockSpec((1, 3 * D), lambda i: (0, 0)),
            ],
            out_specs=tuple(pl.BlockSpec((tm, D), lambda i: (i, 0))
                            for _ in range(3)),
        ),
        compiler_params=_compiler_params(),
        cost_estimate=pl.CostEstimate(
            flops=flops, transcendentals=0, bytes_accessed=bytes_accessed),
    )(xp, wcat, bq_lora, bv_lora, bias)
    if m_pad != M:
        q, k, v = q[:M], k[:M], v[:M]
    return q, k, v


def linear_res_ln_pallas(x2d, wt, bias2d, res2d, gamma2d, beta2d):
    """LayerNorm(x @ W^T + bias + residual) with everything fused in-kernel."""
    M, Din = x2d.shape
    Dout = wt.shape[1]
    tm, m_pad = _row_tiling(M)
    xp = _pad_rows(x2d, m_pad)
    rp = _pad_rows(res2d, m_pad)
    isz = jnp.dtype(x2d.dtype).itemsize
    flops = 2 * m_pad * Din * Dout + 10 * m_pad * Dout
    bytes_accessed = isz * (2 * m_pad * Din + Din * Dout + m_pad * Dout) + 4 * 3 * Dout
    out = pl.pallas_call(
        _linear_res_ln_kernel,
        out_shape=jax.ShapeDtypeStruct((m_pad, Dout), x2d.dtype),
        grid_spec=pltpu.PrefetchScalarGridSpec(
            num_scalar_prefetch=0,
            grid=(m_pad // tm,),
            in_specs=[
                pl.BlockSpec((tm, Din), lambda i: (i, 0)),
                pl.BlockSpec((Din, Dout), lambda i: (0, 0)),
                pl.BlockSpec((1, Dout), lambda i: (0, 0)),
                pl.BlockSpec((tm, Dout), lambda i: (i, 0)),
                pl.BlockSpec((1, Dout), lambda i: (0, 0)),
                pl.BlockSpec((1, Dout), lambda i: (0, 0)),
            ],
            out_specs=pl.BlockSpec((tm, Dout), lambda i: (i, 0)),
        ),
        compiler_params=_compiler_params(),
        cost_estimate=pl.CostEstimate(
            flops=flops, transcendentals=m_pad,
            bytes_accessed=bytes_accessed),
    )(xp, wt, bias2d, rp, gamma2d, beta2d)
    return out if m_pad == M else out[:M]


def ffn_res_ln_pallas(x2d, wi_t, bi2d, wo2_t, bo22d, gamma2d, beta2d):
    """Fused FFN block: LN(gelu(x@Wi^T+bi)@Wo2^T + bo2 + x)."""
    M, D = x2d.shape
    inter = wi_t.shape[1]
    tm, m_pad = _row_tiling(M)
    xp = _pad_rows(x2d, m_pad)
    isz = jnp.dtype(x2d.dtype).itemsize
    flops = 2 * m_pad * D * inter + 2 * m_pad * inter * D + 10 * m_pad * D
    bytes_accessed = isz * (m_pad * D + D * inter + inter * D + m_pad * D) \
        + 4 * (inter + 3 * D)
    out = pl.pallas_call(
        _ffn_res_ln_kernel,
        out_shape=jax.ShapeDtypeStruct((m_pad, D), x2d.dtype),
        grid_spec=pltpu.PrefetchScalarGridSpec(
            num_scalar_prefetch=0,
            grid=(m_pad // tm,),
            in_specs=[
                pl.BlockSpec((tm, D), lambda i: (i, 0)),
                pl.BlockSpec((D, inter), lambda i: (0, 0)),
                pl.BlockSpec((1, inter), lambda i: (0, 0)),
                pl.BlockSpec((inter, D), lambda i: (0, 0)),
                pl.BlockSpec((1, D), lambda i: (0, 0)),
                pl.BlockSpec((1, D), lambda i: (0, 0)),
                pl.BlockSpec((1, D), lambda i: (0, 0)),
            ],
            out_specs=pl.BlockSpec((tm, D), lambda i: (i, 0)),
        ),
        compiler_params=_compiler_params(),
        cost_estimate=pl.CostEstimate(
            flops=flops, transcendentals=m_pad * inter + m_pad,
            bytes_accessed=bytes_accessed),
    )(xp, wi_t, bi2d, wo2_t, bo22d, gamma2d, beta2d)
    return out if m_pad == M else out[:M]


# ----------------------------------------------------------------------------
# Synthetic QFormer (BERT-style encoder) with LoRA on query / value
# ----------------------------------------------------------------------------
def _layernorm(x, gamma, beta, eps=_LN_EPS):
    mu = jnp.mean(x, axis=-1, keepdims=True)
    var = jnp.mean((x - mu) ** 2, axis=-1, keepdims=True)
    return (x - mu) * jax.lax.rsqrt(var + eps) * gamma + beta


def _mha(q2, k2, v2, B, S, num_heads):
    D = q2.shape[-1]
    hd = D // num_heads

    def split(t):  # (B*S, D) -> (B, H, S, hd)
        return t.reshape(B, S, num_heads, hd).transpose(0, 2, 1, 3)

    qh, kh, vh = split(q2), split(k2), split(v2)
    scores = jnp.einsum("bhqd,bhkd->bhqk", qh, kh,
                        preferred_element_type=jnp.float32) / math.sqrt(hd)
    probs = jax.nn.softmax(scores, axis=-1)
    ctx = jnp.einsum("bhqk,bhkd->bhqd", probs.astype(vh.dtype), vh,
                     preferred_element_type=jnp.float32)
    return ctx.transpose(0, 2, 1, 3).reshape(B * S, D)


def make_params(key, *, num_layers, dim, r, inter, modulars):
    ks = jax.random.split(key, num_layers * 32 + 1)
    ki = iter(range(len(ks)))

    def dense_init(dout, din):
        bound = 1.0 / math.sqrt(din)
        w = jax.random.uniform(ks[next(ki)], (dout, din), jnp.float32,
                               -bound, bound)
        bb = jax.random.uniform(ks[next(ki)], (dout,), jnp.float32,
                                -bound, bound)
        return w, bb

    def lora_init():
        # kaiming_uniform_(a=sqrt(5)) on shape (r, dim) -> bound = 1/sqrt(dim)
        bound = 1.0 / math.sqrt(dim)
        a = jax.random.uniform(ks[next(ki)], (r, dim), jnp.float32,
                               -bound, bound)
        bmat = jnp.zeros((dim, r), jnp.float32)  # faithful zero init of w_B
        return {"a": a, "b": bmat}

    layers = []
    for _ in range(num_layers):
        wq, bq = dense_init(dim, dim)
        wk, bk = dense_init(dim, dim)
        wv, bv = dense_init(dim, dim)
        wo, bo = dense_init(dim, dim)
        wi, bi = dense_init(inter, dim)
        wo2, bo2 = dense_init(dim, inter)
        layers.append(dict(
            wq=wq, bq=bq, wk=wk, bk=bk, wv=wv, bv=bv,
            wo=wo, bo=bo, wi=wi, bi=bi, wo2=wo2, bo2=bo2,
            lora_q={m: lora_init() for m in modulars},
            lora_v={m: lora_init() for m in modulars},
            ln1_g=jnp.ones((dim,)), ln1_b=jnp.zeros((dim,)),
            ln2_g=jnp.ones((dim,)), ln2_b=jnp.zeros((dim,)),
        ))
    return dict(layers=layers)


def pack_params(params, *, dim, r, modulars, param_dtype=jnp.bfloat16):
    """Hoisted once: pre-transpose / pre-concatenate all kernel operands.

    GEMM weights are stored in `param_dtype` (bf16 by default for MXU peak and
    half the HBM/VMEM traffic).  LoRA-B, biases and LayerNorm params stay f32
    (tiny; avoids double-rounding the low-rank path)."""
    packed = []
    for L in params["layers"]:
        qkv_w, bq_lora, bv_lora = {}, {}, {}
        for m in modulars:
            aq = L["lora_q"][m]["a"]       # (r, dim)
            av = L["lora_v"][m]["a"]
            # fused QKV(+LoRA-A) weight: (dim, 3*dim + 2r)
            qkv_w[m] = jnp.concatenate(
                [L["wq"].T, L["wk"].T, L["wv"].T, aq.T, av.T],
                axis=1).astype(param_dtype)
            bq_lora[m] = L["lora_q"][m]["b"].T.astype(jnp.float32)   # (r, dim)
            bv_lora[m] = L["lora_v"][m]["b"].T.astype(jnp.float32)
        packed.append(dict(
            qkv_w=qkv_w, bq_lora=bq_lora, bv_lora=bv_lora,
            qkv_bias=jnp.concatenate([L["bq"], L["bk"], L["bv"]]
                                     ).reshape(1, 3 * dim).astype(jnp.float32),
            wo_t=L["wo"].T.astype(param_dtype),
            bo=L["bo"].reshape(1, -1).astype(jnp.float32),
            wi_t=L["wi"].T.astype(param_dtype),
            bi=L["bi"].reshape(1, -1).astype(jnp.float32),
            wo2_t=L["wo2"].T.astype(param_dtype),
            bo2=L["bo2"].reshape(1, -1).astype(jnp.float32),
            ln1_g=L["ln1_g"].reshape(1, -1).astype(jnp.float32),
            ln1_b=L["ln1_b"].reshape(1, -1).astype(jnp.float32),
            ln2_g=L["ln2_g"].reshape(1, -1).astype(jnp.float32),
            ln2_b=L["ln2_b"].reshape(1, -1).astype(jnp.float32),
        ))
    return packed


def qformer_forward_pallas(packed_layers, x, *, num_heads, modular,
                           compute_dtype=jnp.bfloat16):
    B, S, D = x.shape
    M = B * S
    in_dtype = x.dtype
    tm, m_pad = _row_tiling(M)
    h2 = x.reshape(M, D).astype(compute_dtype)
    h2 = _pad_rows(h2, m_pad)          # padded ONCE for the whole forward
    for L in packed_layers:
        q, k, v = qkv_lora_pallas(h2, L["qkv_w"][modular],
                                  L["bq_lora"][modular],
                                  L["bv_lora"][modular], L["qkv_bias"])
        if m_pad != M:
            q, k, v = q[:M], k[:M], v[:M]
        ctx = _mha(q, k, v, B, S, num_heads).astype(compute_dtype)
        ctx = _pad_rows(ctx, m_pad)
        # attn-output projection + residual + LayerNorm, fused
        h1 = linear_res_ln_pallas(ctx, L["wo_t"], L["bo"], h2,
                                  L["ln1_g"], L["ln1_b"])
        # full FFN block (up-proj + GELU + down-proj + residual + LN), fused
        h2 = ffn_res_ln_pallas(h1, L["wi_t"], L["bi"], L["wo2_t"], L["bo2"],
                               L["ln2_g"], L["ln2_b"])
    out = h2 if m_pad == M else h2[:M]
    return out.reshape(B, S, D).astype(in_dtype)


def qformer_forward_ref(params, x, *, num_heads, modular):
    """Pure-JAX f32 reference using the raw (unpacked, un-fused) weights."""
    B, S, D = x.shape
    h = x
    for L in params["layers"]:
        x2 = h.reshape(B * S, D)
        aq, bq_l = L["lora_q"][modular]["a"], L["lora_q"][modular]["b"]
        av, bv_l = L["lora_v"][modular]["a"], L["lora_v"][modular]["b"]
        q = x2 @ L["wq"].T + L["bq"] + (x2 @ aq.T) @ bq_l.T
        k = x2 @ L["wk"].T + L["bk"]
        v = x2 @ L["wv"].T + L["bv"] + (x2 @ av.T) @ bv_l.T
        ctx = _mha(q, k, v, B, S, num_heads)
        attn_out = ctx @ L["wo"].T + L["bo"]
        h1 = _layernorm((attn_out + x2).reshape(B, S, D),
                        L["ln1_g"], L["ln1_b"])
        h1_2 = h1.reshape(B * S, D)
        ff = _gelu_tanh(h1_2 @ L["wi"].T + L["bi"])
        ff = ff @ L["wo2"].T + L["bo2"]
        h = _layernorm((ff + h1_2).reshape(B, S, D), L["ln2_g"], L["ln2_b"])
    return h


def randomize_lora_b(params, key, scale=0.1):
    """Replace the (zero-initialised) LoRA-B weights with random values so the
    low-rank path is actually exercised end-to-end."""
    new_layers = []
    for L in params["layers"]:
        L2 = dict(L)
        for name in ("lora_q", "lora_v"):
            new_group = {}
            for m, ab in L[name].items():
                key, sub = jax.random.split(key)
                new_group[m] = dict(
                    a=ab["a"],
                    b=jax.random.normal(sub, ab["b"].shape, jnp.float32) * scale)
            L2[name] = new_group
        new_layers.append(L2)
    return dict(layers=new_layers)


# ----------------------------------------------------------------------------
if __name__ == "__main__":
    key = jax.random.PRNGKey(0)
    B, S, D, H, R, INTER, NLAYERS = 2, 8, 32, 4, 4, 64, 2
    modulars = ["rgb", "depth"]

    kp, kx, ka, kb, kbl = jax.random.split(key, 5)
    params = make_params(kp, num_layers=NLAYERS, dim=D, r=R,
                         inter=INTER, modulars=modulars)
    x = jax.random.normal(kx, (B, S, D), jnp.float32)

    # 1) f32 path (tight tolerance), faithful zero-init LoRA-B, "rgb" branch.
    packed_f32 = pack_params(params, dim=D, r=R, modulars=modulars,
                             param_dtype=jnp.float32)
    out = jax.block_until_ready(qformer_forward_pallas(
        packed_f32, x, num_heads=H, modular="rgb",
        compute_dtype=jnp.float32))
    ref = qformer_forward_ref(params, x, num_heads=H, modular="rgb")
    assert out.shape == (B, S, D)
    assert jnp.allclose(out, ref, atol=2e-5, rtol=2e-5), "forward mismatch"

    # 2) f32 path with non-zero LoRA-B (exercises the fused low-rank path
    #    end-to-end) on the "depth" modular branch.
    params_nz = randomize_lora_b(params, kbl, scale=0.1)
    packed_nz_f32 = pack_params(params_nz, dim=D, r=R, modulars=modulars,
                                param_dtype=jnp.float32)
    out_nz = jax.block_until_ready(qformer_forward_pallas(
        packed_nz_f32, x, num_heads=H, modular="depth",
        compute_dtype=jnp.float32))
    ref_nz = qformer_forward_ref(params_nz, x, num_heads=H, modular="depth")
    assert jnp.allclose(out_nz, ref_nz, atol=2e-5, rtol=2e-5), \
        "forward mismatch (non-zero LoRA-B)"

    # 3) bf16 performance path (default packing) — loose sanity tolerance
    #    against the f32 reference.
    packed_bf16 = pack_params(params_nz, dim=D, r=R, modulars=modulars,
                              param_dtype=jnp.bfloat16)
    out_bf16 = jax.block_until_ready(qformer_forward_pallas(
        packed_bf16, x, num_heads=H, modular="depth",
        compute_dtype=jnp.bfloat16))
    assert out_bf16.shape == (B, S, D)
    assert bool(jnp.all(jnp.isfinite(out_bf16)))
    assert float(jnp.max(jnp.abs(out_bf16.astype(jnp.float32) - ref_nz))) < 0.35, \
        "bf16 forward diverged from f32 reference"

    # 4) standalone check of the single LoRA-linear kernel (the exact
    #    _LoRALayer_multimodal hot path) with non-zero A and B, f32.
    x2 = x.reshape(B * S, D)
    w = params["layers"][0]["wq"]
    b = params["layers"][0]["bq"]
    a_rand = jax.random.normal(ka, (R, D), jnp.float32) * 0.1
    b_rand = jax.random.normal(kb, (D, R), jnp.float32) * 0.1
    wcat = jnp.concatenate([w.T, a_rand.T], axis=1)        # (D, D + R)
    y_pl = jax.block_until_ready(
        lora_linear_pallas(x2, wcat, b_rand.T, b.reshape(1, -1)))
    y_rf = x2 @ w.T + b + (x2 @ a_rand.T) @ b_rand.T
    assert jnp.allclose(y_pl, y_rf, atol=2e-5, rtol=2e-5), "kernel mismatch"

    print("KERNEL_OK")
</pallas_src>

<mosaic_0001>
module attributes {stable_mosaic.version = 11 : i64} {
  func.func @_qkv_lora_kernel(%arg0: i32, %arg1: memref<16x32xf32, #tpu.memory_space<vmem>>, %arg2: memref<32x104xf32, #tpu.memory_space<vmem>>, %arg3: memref<4x32xf32, #tpu.memory_space<vmem>>, %arg4: memref<4x32xf32, #tpu.memory_space<vmem>>, %arg5: memref<1x96xf32, #tpu.memory_space<vmem>>, %arg6: memref<16x32xf32, #tpu.memory_space<vmem>>, %arg7: memref<16x32xf32, #tpu.memory_space<vmem>>, %arg8: memref<16x32xf32, #tpu.memory_space<vmem>>) attributes {dimension_semantics = [#tpu.dimension_semantics<parallel>], iteration_bounds = array<i64: 1>, scalar_prefetch = 0 : i64, scratch_operands = 0 : i64, tpu.core_type = #tpu.core_type<tc>, window_params = [{transform_indices = @transform_0, window_bounds = array<i64: 16, 32>}, {pipeline_mode = #tpu.pipeline_mode<synchronous>, transform_indices = @transform_1, window_bounds = array<i64: 32, 104>}, {pipeline_mode = #tpu.pipeline_mode<synchronous>, transform_indices = @transform_2, window_bounds = array<i64: 4, 32>}, {pipeline_mode = #tpu.pipeline_mode<synchronous>, transform_indices = @transform_3, window_bounds = array<i64: 4, 32>}, {pipeline_mode = #tpu.pipeline_mode<synchronous>, transform_indices = @transform_4, window_bounds = array<i64: 1, 96>}, {transform_indices = @transform_5, window_bounds = array<i64: 16, 32>}, {transform_indices = @transform_6, window_bounds = array<i64: 16, 32>}, {transform_indices = @transform_7, window_bounds = array<i64: 16, 32>}]} {
    %c0 = arith.constant 0 : index
    %c0_0 = arith.constant 0 : index
    %0 = vector.load %arg1[%c0, %c0_0] : memref<16x32xf32, #tpu.memory_space<vmem>>, vector<16x32xf32>
    %c0_1 = arith.constant 0 : index
    %c0_2 = arith.constant 0 : index
    %1 = vector.load %arg2[%c0_1, %c0_2] : memref<32x104xf32, #tpu.memory_space<vmem>>, vector<32x104xf32>
    %cst = arith.constant dense<0.000000e+00> : vector<16x104xf32>
    %2 = tpu.matmul %0, %1, %cst {dimension_numbers = #tpu.dot_dimension_numbers<[1], [0], [0], [1], [0, 0, 1, 1], [], []>} : vector<16x32xf32>, vector<32x104xf32>, vector<16x104xf32> -> vector<16x104xf32>
    %c0_3 = arith.constant 0 : index
    %c0_4 = arith.constant 0 : index
    %3 = vector.load %arg5[%c0_3, %c0_4] : memref<1x96xf32, #tpu.memory_space<vmem>>, vector<1x96xf32>
    %4 = vector.extract_strided_slice %2 {offsets = [0, 96], sizes = [16, 4], strides = [1, 1]} : vector<16x104xf32> to vector<16x4xf32>
    %5 = vector.extract_strided_slice %2 {offsets = [0, 100], sizes = [16, 4], strides = [1, 1]} : vector<16x104xf32> to vector<16x4xf32>
    %6 = vector.extract_strided_slice %2 {offsets = [0, 0], sizes = [16, 32], strides = [1, 1]} : vector<16x104xf32> to vector<16x32xf32>
    %7 = vector.extract_strided_slice %3 {offsets = [0, 0], sizes = [1, 32], strides = [1, 1]} : vector<1x96xf32> to vector<1x32xf32>
    %8 = vector.broadcast %7 : vector<1x32xf32> to vector<16x32xf32>
    %9 = arith.addf %6, %8 : vector<16x32xf32>
    %c0_5 = arith.constant 0 : index
    %c0_6 = arith.constant 0 : index
    %10 = vector.load %arg3[%c0_5, %c0_6] : memref<4x32xf32, #tpu.memory_space<vmem>>, vector<4x32xf32>
    %cst_7 = arith.constant dense<0.000000e+00> : vector<16x32xf32>
    %11 = tpu.matmul %4, %10, %cst_7 {dimension_numbers = #tpu.dot_dimension_numbers<[1], [0], [0], [1], [0, 0, 1, 1], [], []>} : vector<16x4xf32>, vector<4x32xf32>, vector<16x32xf32> -> vector<16x32xf32>
    %12 = arith.addf %9, %11 : vector<16x32xf32>
    %13 = vector.extract_strided_slice %2 {offsets = [0, 32], sizes = [16, 32], strides = [1, 1]} : vector<16x104xf32> to vector<16x32xf32>
    %14 = vector.extract_strided_slice %3 {offsets = [0, 32], sizes = [1, 32], strides = [1, 1]} : vector<1x96xf32> to vector<1x32xf32>
    %15 = vector.broadcast %14 : vector<1x32xf32> to vector<16x32xf32>
    %16 = arith.addf %13, %15 : vector<16x32xf32>
    %17 = vector.extract_strided_slice %2 {offsets = [0, 64], sizes = [16, 32], strides = [1, 1]} : vector<16x104xf32> to vector<16x32xf32>
    %18 = vector.extract_strided_slice %3 {offsets = [0, 64], sizes = [1, 32], strides = [1, 1]} : vector<1x96xf32> to vector<1x32xf32>
    %19 = vector.broadcast %18 : vector<1x32xf32> to vector<16x32xf32>
    %20 = arith.addf %17, %19 : vector<16x32xf32>
    %c0_8 = arith.constant 0 : index
    %c0_9 = arith.constant 0 : index
    %21 = vector.load %arg4[%c0_8, %c0_9] : memref<4x32xf32, #tpu.memory_space<vmem>>, vector<4x32xf32>
    %cst_10 = arith.constant dense<0.000000e+00> : vector<16x32xf32>
    %22 = tpu.matmul %5, %21, %cst_10 {dimension_numbers = #tpu.dot_dimension_numbers<[1], [0], [0], [1], [0, 0, 1, 1], [], []>} : vector<16x4xf32>, vector<4x32xf32>, vector<16x32xf32> -> vector<16x32xf32>
    %23 = arith.addf %20, %22 : vector<16x32xf32>
    %c0_11 = arith.constant 0 : index
    %c0_12 = arith.constant 0 : index
    %24 = vector.load %arg6[%c0_11, %c0_12] : memref<16x32xf32, #tpu.memory_space<vmem>>, vector<16x32xf32>
    tpu.vector_store %arg6[%c0_11, %c0_12], %12 {strides = array<i32>} : memref<16x32xf32, #tpu.memory_space<vmem>>, vector<16x32xf32>,
    %c0_13 = arith.constant 0 : index
    %c0_14 = arith.constant 0 : index
    %25 = vector.load %arg7[%c0_13, %c0_14] : memref<16x32xf32, #tpu.memory_space<vmem>>, vector<16x32xf32>
    tpu.vector_store %arg7[%c0_13, %c0_14], %16 {strides = array<i32>} : memref<16x32xf32, #tpu.memory_space<vmem>>, vector<16x32xf32>,
    %c0_15 = arith.constant 0 : index
    %c0_16 = arith.constant 0 : index
    %26 = vector.load %arg8[%c0_15, %c0_16] : memref<16x32xf32, #tpu.memory_space<vmem>>, vector<16x32xf32>
    tpu.vector_store %arg8[%c0_15, %c0_16], %23 {strides = array<i32>} : memref<16x32xf32, #tpu.memory_space<vmem>>, vector<16x32xf32>,
    return
  }
  func.func @transform_0(%arg0: i32) -> (i32, i32) {
    %c0_i32 = arith.constant 0 : i32
    %c0_i32_0 = arith.constant 0 : i32
    return %arg0, %c0_i32 : i32, i32
  }
  func.func @transform_1(%arg0: i32) -> (i32, i32) {
    %c0_i32 = arith.constant 0 : i32
    %c0_i32_0 = arith.constant 0 : i32
    %c0_i32_1 = arith.constant 0 : i32
    return %c0_i32, %c0_i32_0 : i32, i32
  }
  func.func @transform_2(%arg0: i32) -> (i32, i32) {
    %c0_i32 = arith.constant 0 : i32
    %c0_i32_0 = arith.constant 0 : i32
    %c0_i32_1 = arith.constant 0 : i32
    return %c0_i32, %c0_i32_0 : i32, i32
  }
  func.func @transform_3(%arg0: i32) -> (i32, i32) {
    %c0_i32 = arith.constant 0 : i32
    %c0_i32_0 = arith.constant 0 : i32
    %c0_i32_1 = arith.constant 0 : i32
    return %c0_i32, %c0_i32_0 : i32, i32
  }
  func.func @transform_4(%arg0: i32) -> (i32, i32) {
    %c0_i32 = arith.constant 0 : i32
    %c0_i32_0 = arith.constant 0 : i32
    %c0_i32_1 = arith.constant 0 : i32
    return %c0_i32, %c0_i32_0 : i32, i32
  }
  func.func @transform_5(%arg0: i32) -> (i32, i32) {
    %c0_i32 = arith.constant 0 : i32
    %c0_i32_0 = arith.constant 0 : i32
    return %arg0, %c0_i32 : i32, i32
  }
  func.func @transform_6(%arg0: i32) -> (i32, i32) {
    %c0_i32 = arith.constant 0 : i32
    %c0_i32_0 = arith.constant 0 : i32
    return %arg0, %c0_i32 : i32, i32
  }
  func.func @transform_7(%arg0: i32) -> (i32, i32) {
    %c0_i32 = arith.constant 0 : i32
    %c0_i32_0 = arith.constant 0 : i32
    return %arg0, %c0_i32 : i32, i32
  }
}

</mosaic_0001>

<bundles_post_ra>
// kernel: tpu_custom_call.1
= control target key start
LH: loop header
LB: loop body
LE: loop exit
PB: predicated region body
PF: predicated region fallthrough
CT: control target
= control target key end

     0   :  { %13 = vsyncpa [#allocation3], 0  ;;  %s707_s0 = inlined_call_operand.hbm [shape: f32[16,32], index: 0, kind: input, shape index: {}]   ;;  %s708_s1 = inlined_call_operand.hbm [shape: f32[32,104], index: 1, kind: input, shape index: {}]   ;;  %s709_s2 = inlined_call_operand.hbm [shape: f32[4,32], index: 2, kind: input, shape index: {}]   ;;  %s710_s3 = inlined_call_operand.vmem [shape: f32[4,32], index: 3, kind: input, shape index: {}]   ;;  %s711_s4 = inlined_call_operand.vmem [shape: f32[1,96], index: 4, kind: input, shape index: {}]   ;;  %s712_s5 = inlined_call_operand.hbm [shape: f32[16,32], index: 5, kind: output, shape index: {0}]   ;;  %s713_s6 = inlined_call_operand.hbm [shape: f32[16,32], index: 6, kind: output, shape index: {1}]   ;;  %s714_s7 = inlined_call_operand.hbm [shape: f32[16,32], index: 7, kind: output, shape index: {2}]  }
   0x1   :  { %14 = vsyncpa [#allocation6], 0 }
   0x2   :  { %15 = vsyncpa [#allocation4], 0 }
   0x3   :  { %16 = vsyncpa [#allocation10], 0  ;;  %s604_s24 = smov [#allocation5]   ;;  %s605_s26 = smov [#allocation2]  }
   0x4   :  { %s34_s25 = sshll.u32 %s604_s24, 4  ;;  %s22_s27 = sshll.u32 %s605_s26, 4  ;;  %s35_s25 = int_to_ptr.vmem [resolvable:$true] %s34_s25  ;;  %s23_s27 = int_to_ptr.vmem [resolvable:$true] %s22_s27 }
   0x5   :  { %s484_s28 = scalar_lea.vmem %s35_s25, 512  ;;  %p489_p1 = scmp.lt.s32.totalorder %s35_s25, %s35_s25 }
   0x6   :  { %p485_p0 = scmp.ne.s32.totalorder %s35_s25, %s484_s28  ;;  %p490_p2 = scmp.lt.s32.totalorder %s484_s28, %s484_s28 }
   0x8   :  { %p491_p3 = por %p490_p2, %p489_p1 }
   0xa   :  { %p492_p4 = pnand %p491_p3, %p485_p0 }
   0xc   :  { %495 = shalt.err (!%p492_p4)
}
   0xd   :  { %s606_s29 = smov 128   ;;  %s607_s30 = smov 8  }
   0xe   :  { %40 = dma.hbm_to_vmem [thread:$0]  %s708_s1, 512, %s35_s25, [#allocation6], %s606_s29, %s606_s29, %s607_s30  }
   0xf   :  { %s504_s10 = scalar_lea.vmem %s23_s27, 256  ;;  %p509_p6 = scmp.lt.s32.totalorder %s23_s27, %s23_s27 }
  0x10   :  { %p505_p5 = scmp.ne.s32.totalorder %s23_s27, %s504_s10  ;;  %p510_p7 = scmp.lt.s32.totalorder %s504_s10, %s504_s10 }
  0x12   :  { %p511_p8 = por %p510_p7, %p509_p6 }
  0x14   :  { %p512_p9 = pnand %p511_p8, %p505_p5 }
  0x16   :  { %515 = shalt.err (!%p512_p9)
}
  0x17   :  { %28 = dma.hbm_to_vmem [thread:$0]  %s707_s0, 256, %s23_s27, [#allocation3], %s606_s29, %s606_s29, %s607_s30  }
  0x18   :  { %s608_s13 = smov [#allocation7]  }
  0x19   :  { %s47_s14 = sshll.u32 %s608_s13, 4  ;;  %s48_s14 = int_to_ptr.vmem [resolvable:$true] %s47_s14 }
  0x1a   :  { %s524_s15 = scalar_lea.vmem %s48_s14, 64  ;;  %p529_p11 = scmp.lt.s32.totalorder %s48_s14, %s48_s14 }
  0x1b   :  { %p525_p10 = scmp.ne.s32.totalorder %s48_s14, %s524_s15  ;;  %p530_p12 = scmp.lt.s32.totalorder %s524_s15, %s524_s15 }
  0x1d   :  { %p531_p13 = por %p530_p12, %p529_p11 }
  0x1f   :  { %p532_p0 = pnand %p531_p13, %p525_p10 }
  0x21   :  { %535 = shalt.err (!%p532_p0)
}
  0x22   :  { %50 = dma.hbm_to_vmem [thread:$0]  %s709_s2, 64, %s48_s14, [#allocation6]  }
  0x23   :  { %596 = dma.done.wait [#allocation3], 256  }
  0x24   :  { %597 = vsyncadd [#allocation3], 4294967040 }
  0x25   :  { %598 = dma.done.wait [#allocation6], 576  }
  0x26   :  { %599 = vsyncadd [#allocation6], 4294966720  ;;  %vm70_vm0 = vcmask 261120   ;;  %v69_v0 = vld [vmem:[#allocation5 + $0x18] sm:$0xff]  ;;  %v68_v1 = vld [vmem:[#allocation5 + $0x10] sm:$0xff]  ;;  %vm173_vm1 = vcmask 1043456  }
  0x27   :  { %443 = vmatprep.subr.mxu0 %v69_v0  ;;  %v64_v2 = vld [vmem:[#allocation2] sm:$0xff]  ;;  %v67_v3 = vld [vmem:[#allocation5 + $0x8] sm:$0xff]  ;;  %v66_v4 = vld [vmem:[#allocation5] sm:$0xff]  ;;  %s609_s17 = smov 28   ;;  %s610_s18 = smov 32   ;;  %vm168_vm2 = vcmask 31744  }
  0x28   :  { %444 = vmatpush3.msra.mxu0 %v69_v0  ;;  %451 = vmatprep.mubr.msk.f32.mxu0 %vm70_vm0, %v64_v2  ;;  %v65_v5 = vld [vmem:[#allocation2 + $0x8] sm:$0xff]  ;;  %v161_v6 = vld [vmem:[#allocation7] sm:$0xf]  ;;  %v254_v7 = vld [vmem:[%s710_s3] sm:$0xf]  ;;  %s611_s20 = smov 64  }
  0x29   :  { %445 = vmatprep.subr.mxu0 %v68_v1  ;;  %454 = vmatprep.subr.msk.mxu1 %vm173_vm1, %v161_v6  ;;  %v424_v14 = vld [vmem:[%s711_s4] ss:$0 sm:$0xff]  ;;  %s612_s21 = smov 96   ;;  %s613_s22 = smov [#allocation8]  }
  0x2a   :  { %446 = vmatpush3.msra.mxu0 %v68_v1  ;;  %455 = vmatpush3.msk.msra.mxu1 %vm173_vm1, %v161_v6  ;;  %s378_s4 = sshll.u32 %s613_s22, 4  ;;  %s379_s4 = int_to_ptr.vmem [resolvable:$true] %s378_s4 }
  0x2b   :  { %447 = vmatprep.subr.mxu0 %v67_v3  ;;  %459 = vmatprep.subr.msk.mxu1 %vm173_vm1, %v254_v7  ;;  %s536_s23 = scalar_lea.vmem %s379_s4, 256  ;;  %p541_p2 = scmp.lt.s32.totalorder %s379_s4, %s379_s4 }
  0x2c   :  { %448 = vmatpush3.msra.mxu0 %v67_v3  ;;  %p537_p1 = scmp.ne.s32.totalorder %s379_s4, %s536_s23  ;;  %p542_p3 = scmp.lt.s32.totalorder %s536_s23, %s536_s23 }
  0x2d   :  { %449 = vmatprep.subr.mxu0 %v66_v4 }
  0x2e   :  { %450 = vmatpush3.msra.mxu0 %v66_v4  ;;  %p543_p4 = por %p542_p3, %p541_p2 }
  0x2f   :  { %452 = vmatmul.mubr.msk.f32.vlgmr.msra.gmra.mxu0 %vm70_vm0, %v65_v5 }
  0x30   :  { %p544_p5 = pnand %p543_p4, %p537_p1 }
  0xef   :  { %v453_v8 = vpop.f32.mrf.mxu0 }
  0xf0   :  { %v160_v15 = vadd.f32 %v453_v8, %v424_v14 }
  0xf1   :  { %v143_v9 = vpop.f32.mrf.mxu0 }
  0xf2   :  { %255 = vrot.lane.b32.xlu1 %v143_v9, %s609_s17  ;;  %164 = vrot.lane.b32.xlu0 %v143_v9, %s610_s18  ;;  %v159_v17 = vadd.f32 %v424_v14, %v143_v9 }
  0xf6   :  { %257 = vrot.lane.b32.xlu1 %v453_v8, %s609_s17  ;;  %166 = vrot.lane.b32.xlu0 %v453_v8, %s610_s18 }
 0x164   :  { %v165_v10 = vpop.permute.xlu0 %164  ;;  %v256_v11 = vpop.permute.xlu1 %255 }
 0x165   :  { %456 = vmatprep.mubr.msk.f32.mxu1 %vm168_vm2, %v165_v10 }
 0x168   :  { %v167_v12 = vpop.permute.xlu0 %166  ;;  %v258_v13 = vpop.permute.xlu1 %257 }
 0x169   :  { %457 = vmatmul.mubr.msk.f32.vlgmr.msra.gmra.mxu1 %vm168_vm2, %v167_v12 }
 0x16a   :  { %460 = vmatpush3.msk.msra.mxu1 %vm173_vm1, %v254_v7  ;;  %461 = vmatprep.mubr.msk.f32.mxu1 %vm168_vm2, %v256_v11 }
 0x16d   :  { %462 = vmatmul.mubr.msk.f32.vlgmr.msra.gmra.mxu1 %vm168_vm2, %v258_v13 }
 0x229   :  { %v458_v16 = vpop.f32.mrf.mxu1 }
 0x22a   :  { %v253_v18 = vadd.f32 %v458_v16, %v160_v15 }
 0x22b   :  { %v243_v19 = vpop.f32.mrf.mxu1 }
 0x22c   :  { %352 = vst.msk [vmem:[#allocation8 + $0x8] sm:$0xff] %vm70_vm0, %v253_v18  ;;  %v252_v20 = vadd.f32 %v243_v19, %v159_v17 }
 0x22d   :  { %v463_v21 = vpop.f32.mrf.mxu1 }
 0x22e   :  { %351 = vst.msk [vmem:[#allocation8] sm:$0xff] %vm70_vm0, %v252_v20  ;;  %345 = vrot.lane.b32.xlu1 %v463_v21, %s611_s20 }
 0x22f   :  { %v332_v22 = vpop.f32.mrf.mxu1 }
 0x230   :  { %343 = vrot.lane.b32.xlu0 %v332_v22, %s611_s20 }
 0x232   :  { %357 = vrot.lane.b32.xlu1 %v160_v15, %s612_s21 }
 0x234   :  { %355 = vrot.lane.b32.xlu0 %v159_v17, %s612_s21 }
 0x235   :  { %547 = shalt.err (!%p544_p5)
}
 0x236   :  { %384 = dma.vmem_to_hbm [thread:$0]  %s379_s4, 256, %s712_s5, [#allocation4], %s606_s29, %s606_s29, %s607_s30  }
 0x237   :  { %s614_s26 = smov [#allocation9]  }
 0x238   :  { %s390_s27 = sshll.u32 %s614_s26, 4  ;;  %s391_s27 = int_to_ptr.vmem [resolvable:$true] %s390_s27 }
 0x239   :  { %s556_s28 = scalar_lea.vmem %s391_s27, 256  ;;  %p561_p7 = scmp.lt.s32.totalorder %s391_s27, %s391_s27 }
 0x23a   :  { %p557_p6 = scmp.ne.s32.totalorder %s391_s27, %s556_s28  ;;  %p562_p8 = scmp.lt.s32.totalorder %s556_s28, %s556_s28 }
 0x23c   :  { %p563_p9 = por %p562_p8, %p561_p7 }
 0x23e   :  { %p564_p10 = pnand %p563_p9, %p557_p6 }
 0x2a0   :  { %v346_v23 = vpop.permute.xlu1 %345 }
 0x2a1   :  { %v350_v24 = vadd.f32 %v346_v23, %v160_v15 }
 0x2a2   :  { %v344_v25 = vpop.permute.xlu0 %343 }
 0x2a3   :  { %v349_v26 = vadd.f32 %v344_v25, %v159_v17  ;;  %367 = vrot.lane.b32.xlu1 %v350_v24, %s611_s20 }
 0x2a4   :  { %v358_v27 = vpop.permute.xlu1 %357 }
 0x2a5   :  { %362 = vst.msk [vmem:[#allocation9 + $0x8] sm:$0xff] %vm70_vm0, %v358_v27  ;;  %365 = vrot.lane.b32.xlu0 %v349_v26, %s611_s20 }
 0x2a6   :  { %v356_v28 = vpop.permute.xlu0 %355 }
 0x2a7   :  { %361 = vst.msk [vmem:[#allocation9] sm:$0xff] %vm70_vm0, %v356_v28 }
 0x2a8   :  { %567 = shalt.err (!%p564_p10)
}
 0x2a9   :  { %396 = dma.vmem_to_hbm [thread:$0]  %s391_s27, 256, %s713_s6, [#allocation10], %s606_s29, %s606_s29, %s607_s30  }
 0x2aa   :  { %s615_s9 = smov [#allocation11]  }
 0x2ab   :  { %s402_s10 = sshll.u32 %s615_s9, 4  ;;  %s403_s10 = int_to_ptr.vmem [resolvable:$true] %s402_s10 }
 0x2ac   :  { %s576_s11 = scalar_lea.vmem %s403_s10, 256  ;;  %p581_p12 = scmp.lt.s32.totalorder %s403_s10, %s403_s10 }
 0x2ad   :  { %p577_p11 = scmp.ne.s32.totalorder %s403_s10, %s576_s11  ;;  %p582_p13 = scmp.lt.s32.totalorder %s576_s11, %s576_s11 }
 0x2af   :  { %p583_p0 = por %p582_p13, %p581_p12 }
 0x2b1   :  { %p584_p1 = pnand %p583_p0, %p577_p11 }
 0x315   :  { %v368_v29 = vpop.permute.xlu1 %367 }
 0x316   :  { %372 = vst.msk [vmem:[#allocation11 + $0x8] sm:$0xff] %vm70_vm0, %v368_v29 }
 0x317   :  { %v366_v30 = vpop.permute.xlu0 %365 }
 0x318   :  { %371 = vst.msk [vmem:[#allocation11] sm:$0xff] %vm70_vm0, %v366_v30 }
 0x319   :  { %587 = shalt.err (!%p584_p1)
}
 0x31a   :  { %408 = dma.vmem_to_hbm [thread:$0]  %s403_s10, 256, %s714_s7, [#allocation10], %s606_s29, %s606_s29, %s607_s30  }
 0x31b   :  { %600 = dma.done.wait [#allocation4], 256  }
 0x31c   :  { %601 = vsyncadd [#allocation4], 4294967040 }
 0x31d   :  { %602 = dma.done.wait [#allocation10], 512  }
 0x31e   :  { %603 = vsyncadd [#allocation10], 4294966784 }
 0x31f   :  { %418 = vsyncpa [#allocation3], 1 }
 0x320   :  { %419 = vsyncpa [#allocation6], 1 }
 0x321   :  { %420 = vsyncpa [#allocation4], 1 }
 0x322   :  { %421 = vsyncpa [#allocation10], 1 }

</bundles_post_ra>
